<compile_context>
chip_gen: v6e
topology: v6e:2x2x1
jax: 0.10.0
libtpu: 0.0.40
codegen_flags: <defaults>
</compile_context>

<pallas_src>
import functools

import jax
import jax.numpy as jnp
from jax.experimental import pallas as pl
from jax.experimental.pallas import tpu as pltpu

LN_EPS = 1e-5  # torch.nn.LayerNorm default


def _round_up(x, m):
    return (x + m - 1) // m * m


def _cdiv(a, b):
    return (a + b - 1) // b


def _layer_norm(y, gamma, beta):
    mu = jnp.mean(y, axis=-1, keepdims=True)
    c = y - mu
    var = jnp.mean(c * c, axis=-1, keepdims=True)
    return c * jax.lax.rsqrt(var + LN_EPS) * gamma + beta


# ---------------------------------------------------------------------------
# Single-buffering probe: pipeline_mode=pl.Buffered(1) on grid-invariant
# blocks avoids allocating a second VMEM copy of the resident weights.
# ---------------------------------------------------------------------------
def _probe_single_buffering():
    try:
        pl.BlockSpec((8, 128), lambda i: (0, 0), pipeline_mode=pl.Buffered(1))
        return True
    except Exception:
        return False


_SINGLE_BUFFER_OK = _probe_single_buffering()


def _invariant_spec(block_shape, index_map):
    """BlockSpec for a grid-invariant block (fetched from HBM exactly once);
    single-buffered when the installed JAX supports pipeline_mode."""
    if _SINGLE_BUFFER_OK:
        return pl.BlockSpec(block_shape, index_map, pipeline_mode=pl.Buffered(1))
    return pl.BlockSpec(block_shape, index_map)


def _vmem_budget_bytes():
    """Generation-aware VMEM budget with headroom for compiler scratch."""
    try:
        cap = int(pltpu.get_tpu_info().vmem_capacity_bytes)
    except Exception:
        cap = 0
    if cap <= 0:
        cap = 64 * 1024 * 1024  # conservative default (v7x per-TensorCore VMEM)
    # ~25% headroom for compiler-internal scratch/semaphores; never request
    # more than 100 MiB even on 128 MiB parts (v5e/v6e).
    return max(32 * 1024 * 1024, min(cap * 3 // 4, 100 * 1024 * 1024))


# ---------------------------------------------------------------------------
# Kernels
# ---------------------------------------------------------------------------
def _ffn_kernel_resident(x_ref, w1_ref, b1_ref, w2_ref, b2_ref, g_ref, be_ref,
                         o_ref, *, pre_lnorm, matmul_dtype):
    """Whole FFN per row tile; W1/W2 are grid-invariant (VMEM-resident)."""
    x = x_ref[...].astype(jnp.float32)
    xin = _layer_norm(x, g_ref[...], be_ref[...]) if pre_lnorm else x
    h = jnp.dot(xin.astype(matmul_dtype), w1_ref[...],
                preferred_element_type=jnp.float32)
    r = jnp.maximum(h + b1_ref[...], 0.0)                     # Primer-EZ ReLU
    y = jnp.dot((r * r).astype(matmul_dtype), w2_ref[...],    # ... squared
                preferred_element_type=jnp.float32)
    # TODO(synk): dropout omitted (inference semantics); add PRNG masking for training.
    y = y + b2_ref[...] + xin                                  # bias + residual
    if not pre_lnorm:
        y = _layer_norm(y, g_ref[...], be_ref[...])
    o_ref[...] = y.astype(o_ref.dtype)


def _ffn_kernel_ktiled(x_ref, w1_ref, b1_ref, w2_ref, b2_ref, g_ref, be_ref,
                       o_ref, xin_ref, lhs_ref, acc_ref, *,
                       pre_lnorm, matmul_dtype):
    """d_inner-tiled reduction (last grid axis) with f32 VMEM accumulator."""
    k = pl.program_id(1)

    @pl.when(k == 0)
    def _init():
        x = x_ref[...].astype(jnp.float32)
        xin = _layer_norm(x, g_ref[...], be_ref[...]) if pre_lnorm else x
        xin_ref[...] = xin                        # f32, kept for the residual
        lhs_ref[...] = xin.astype(matmul_dtype)   # cast once per row tile
        acc_ref[...] = jnp.zeros_like(acc_ref)

    h = jnp.dot(lhs_ref[...], w1_ref[...], preferred_element_type=jnp.float32)
    r = jnp.maximum(h + b1_ref[...], 0.0)                      # Primer-EZ ReLU^2
    acc_ref[...] += jnp.dot((r * r).astype(matmul_dtype), w2_ref[...],
                            preferred_element_type=jnp.float32)

    @pl.when(k == pl.num_programs(1) - 1)
    def _finalize():
        y = acc_ref[...] + b2_ref[...] + xin_ref[...]          # bias + residual
        if not pre_lnorm:
            y = _layer_norm(y, g_ref[...], be_ref[...])
        o_ref[...] = y.astype(o_ref.dtype)


# ---------------------------------------------------------------------------
# Wrapper
# ---------------------------------------------------------------------------
def positionwise_ff_primer_ez(inp, params, *, pre_lnorm=False, tm=512, tk=512,
                              matmul_dtype=jnp.bfloat16, bf16_activations=False,
                              force_ktiled=False):
    """inp: (seq_len, batch, d_model). Returns the same shape/dtype."""
    seq_len, bsz, d_model = inp.shape
    d_inner = params["w1"].shape[1]
    n = seq_len * bsz
    mm_bytes = jnp.dtype(matmul_dtype).itemsize
    x_dtype = jnp.bfloat16 if bf16_activations else inp.dtype
    io_bytes = jnp.dtype(x_dtype).itemsize
    out_bytes = jnp.dtype(inp.dtype).itemsize
    budget = _vmem_budget_bytes()

    # Row tile: 8-aligned, no bigger than the work, and >=2 tiles whenever
    # there is more than one tile of work (so both v7x TCs get row tiles).
    def _row_tile(req):
        t = max(8, min(_round_up(req, 8), _round_up(n, 8)))
        if n > 8:
            t = min(t, _round_up(_cdiv(n, 2), 8))
        return t

    tm_req = _row_tile(tm)
    wbuf = 1 if _SINGLE_BUFFER_OK else 2          # weight buffers (resident path)

    def _resident_bytes(t):
        w = wbuf * 2 * d_model * d_inner * mm_bytes        # W1 + W2 resident
        xio = 2 * t * d_model * (io_bytes + out_bytes)     # x/out double-buffered
        hid = t * d_inner * (4 + mm_bytes)                 # h (f32) + bf16 recast
        loc = t * d_model * (4 + mm_bytes + 4)             # xin / lhs / y temps
        small = 2 * (d_inner + 3 * d_model) * 4
        return w + xio + hid + loc + small

    # Largest row tile (<= requested) for which the resident-weight path fits.
    resident_tm = None
    if not force_ktiled:
        for cand in sorted({tm_req, 256, 128, 64, 8}, reverse=True):
            t = max(8, _round_up(min(cand, tm_req), 8))
            if _resident_bytes(t) <= budget:
                resident_tm = t
                break

    x2d = inp.reshape(n, d_model).astype(x_dtype)
    b2 = params["b2"].reshape(1, d_model).astype(jnp.float32)
    gamma = params["gamma"].reshape(1, d_model).astype(jnp.float32)
    beta = params["beta"].reshape(1, d_model).astype(jnp.float32)

    # ----------------------- resident-weight fast path -----------------------
    if resident_tm is not None:
        tm_eff = resident_tm
        n_pad = _round_up(n, tm_eff)
        if n_pad != n:
            x2d = jnp.pad(x2d, ((0, n_pad - n), (0, 0)))
        w1 = params["w1"].astype(matmul_dtype)     # bf16 halves weight DMA/VMEM
        w2 = params["w2"].astype(matmul_dtype)
        b1 = params["b1"].reshape(1, d_inner).astype(jnp.float32)

        kernel = functools.partial(_ffn_kernel_resident, pre_lnorm=pre_lnorm,
                                   matmul_dtype=matmul_dtype)
        vmem_limit = int(min(max(_resident_bytes(tm_eff) * 3 // 2,
                                 32 * 1024 * 1024), budget))

        out2d = pl.pallas_call(
            kernel,
            out_shape=jax.ShapeDtypeStruct((n_pad, d_model), inp.dtype),
            grid_spec=pltpu.PrefetchScalarGridSpec(
                num_scalar_prefetch=0,
                grid=(n_pad // tm_eff,),
                in_specs=[
                    pl.BlockSpec((tm_eff, d_model), lambda i: (i, 0)),      # x
                    _invariant_spec((d_model, d_inner), lambda i: (0, 0)),  # W1
                    _invariant_spec((1, d_inner), lambda i: (0, 0)),        # b1
                    _invariant_spec((d_inner, d_model), lambda i: (0, 0)),  # W2
                    _invariant_spec((1, d_model), lambda i: (0, 0)),        # b2
                    _invariant_spec((1, d_model), lambda i: (0, 0)),        # gamma
                    _invariant_spec((1, d_model), lambda i: (0, 0)),        # beta
                ],
                out_specs=pl.BlockSpec((tm_eff, d_model), lambda i: (i, 0)),
                scratch_shapes=[]),
            compiler_params=pltpu.CompilerParams(
                dimension_semantics=("parallel",),
                vmem_limit_bytes=vmem_limit),
        )(x2d, w1, b1, w2, b2, gamma, beta)
        return out2d[:n].reshape(seq_len, bsz, d_model)

    # ----------------------------- k-tiled fallback ---------------------------
    # d_inner tile: full if small; else 256-aligned (fills the 256x256 MXUs on
    # v6e/v7x; 128x128 on v5e is automatically satisfied) with minimal padding.
    if d_inner <= max(tk, 256):
        tk_eff = d_inner
        d_inner_pad = d_inner
    else:
        n_k = _cdiv(d_inner, tk)
        tk_eff = _round_up(_cdiv(d_inner, n_k), 256)
        d_inner_pad = tk_eff * n_k

    def _ktiled_bytes(t):
        est = 2 * t * d_model * io_bytes               # x, double-buffered
        est += 2 * t * d_model * out_bytes             # out, double-buffered
        est += 2 * d_model * tk_eff * mm_bytes         # W1 slab
        est += 2 * tk_eff * d_model * mm_bytes         # W2 slab
        est += 4 * (tk_eff + 3 * d_model) * 4          # b1/b2/gamma/beta
        est += t * d_model * (4 + mm_bytes + 4)        # xin + lhs + acc scratch
        est += t * tk_eff * (4 + mm_bytes)             # h tile (f32) + recast
        return est

    tm_eff = tm_req
    while tm_eff > 64 and _ktiled_bytes(tm_eff) > budget:
        tm_eff = max(64, _round_up(tm_eff // 2, 8))
    n_pad = _round_up(n, tm_eff)
    if n_pad != n:
        x2d = jnp.pad(x2d, ((0, n_pad - n), (0, 0)))

    w1 = params["w1"]
    b1 = params["b1"]
    w2 = params["w2"]
    if d_inner_pad != d_inner:
        pad = d_inner_pad - d_inner        # zero padding is exact: relu(0)^2 = 0
        w1 = jnp.pad(w1, ((0, 0), (0, pad)))
        b1 = jnp.pad(b1, (0, pad))
        w2 = jnp.pad(w2, ((0, pad), (0, 0)))
    w1 = w1.astype(matmul_dtype)
    w2 = w2.astype(matmul_dtype)
    b1 = b1.reshape(1, d_inner_pad).astype(jnp.float32)

    kernel = functools.partial(_ffn_kernel_ktiled, pre_lnorm=pre_lnorm,
                               matmul_dtype=matmul_dtype)
    vmem_limit = int(min(max(_ktiled_bytes(tm_eff) * 3 // 2,
                             32 * 1024 * 1024), budget))

    out2d = pl.pallas_call(
        kernel,
        out_shape=jax.ShapeDtypeStruct((n_pad, d_model), inp.dtype),
        grid_spec=pltpu.PrefetchScalarGridSpec(
            num_scalar_prefetch=0,
            grid=(n_pad // tm_eff, d_inner_pad // tk_eff),
            in_specs=[
                pl.BlockSpec((tm_eff, d_model), lambda i, k: (i, 0)),   # x tile
                pl.BlockSpec((d_model, tk_eff), lambda i, k: (0, k)),   # W1 slab
                pl.BlockSpec((1, tk_eff), lambda i, k: (0, k)),         # b1 slab
                pl.BlockSpec((tk_eff, d_model), lambda i, k: (k, 0)),   # W2 slab
                _invariant_spec((1, d_model), lambda i, k: (0, 0)),     # b2
                _invariant_spec((1, d_model), lambda i, k: (0, 0)),     # gamma
                _invariant_spec((1, d_model), lambda i, k: (0, 0)),     # beta
            ],
            out_specs=pl.BlockSpec((tm_eff, d_model), lambda i, k: (i, 0)),
            scratch_shapes=[
                pltpu.VMEM((tm_eff, d_model), jnp.float32),   # cached (LN'd) input
                pltpu.VMEM((tm_eff, d_model), matmul_dtype),  # its bf16 cast (lhs)
                pltpu.VMEM((tm_eff, d_model), jnp.float32),   # f32 accumulator
            ]),
        compiler_params=pltpu.CompilerParams(
            dimension_semantics=("parallel", "arbitrary"),
            vmem_limit_bytes=vmem_limit),
    )(x2d, w1, b1, w2, b2, gamma, beta)
    return out2d[:n].reshape(seq_len, bsz, d_model)


# ---------------------------------------------------------------------------
# Pure-JAX reference mirroring the PyTorch forward (eval mode) with the same
# bf16-operand / f32-accumulate matmul policy as the kernel.
# ---------------------------------------------------------------------------
def _reference(inp, params, *, pre_lnorm=False, matmul_dtype=jnp.bfloat16):
    s, b, d = inp.shape
    gamma, beta = params["gamma"], params["beta"]

    def ln(y):
        mu = jnp.mean(y, axis=-1, keepdims=True)
        var = jnp.mean((y - mu) ** 2, axis=-1, keepdims=True)
        return (y - mu) * jax.lax.rsqrt(var + LN_EPS) * gamma + beta

    x = ln(inp) if pre_lnorm else inp
    x2 = x.reshape(-1, d)
    h = jnp.dot(x2.astype(matmul_dtype), params["w1"].astype(matmul_dtype),
                preferred_element_type=jnp.float32) + params["b1"]
    h = jnp.maximum(h, 0.0) ** 2
    y = jnp.dot(h.astype(matmul_dtype), params["w2"].astype(matmul_dtype),
                preferred_element_type=jnp.float32) + params["b2"]
    y = y.reshape(s, b, d) + x
    return y if pre_lnorm else ln(y)


def make_params(key, d_model, d_inner):
    k1, k2, k3, k4 = jax.random.split(key, 4)
    lim1 = 1.0 / jnp.sqrt(d_model)
    lim2 = 1.0 / jnp.sqrt(d_inner)
    return {
        "w1": jax.random.uniform(k1, (d_model, d_inner), jnp.float32, -lim1, lim1),
        "b1": jax.random.uniform(k2, (d_inner,), jnp.float32, -lim1, lim1),
        "w2": jax.random.uniform(k3, (d_inner, d_model), jnp.float32, -lim2, lim2),
        "b2": jax.random.uniform(k4, (d_model,), jnp.float32, -lim2, lim2),
        "gamma": jnp.ones((d_model,), jnp.float32),
        "beta": jnp.zeros((d_model,), jnp.float32),
    }


if __name__ == "__main__":
    key = jax.random.PRNGKey(0)

    # Small config exercising the resident-weight fast path (both LN modes).
    d_model, d_inner, seq_len, bsz = 32, 64, 8, 2
    kx, kp, key = jax.random.split(key, 3)
    inp = jax.random.normal(kx, (seq_len, bsz, d_model), jnp.float32)
    params = make_params(kp, d_model, d_inner)
    for pre in (False, True):
        out = jax.block_until_ready(
            positionwise_ff_primer_ez(inp, params, pre_lnorm=pre))
        ref = _reference(inp, params, pre_lnorm=pre)
        assert out.shape == (seq_len, bsz, d_model)
        err = float(jnp.max(jnp.abs(out - ref)))
        assert err < 5e-3, ("resident", pre, err)

    # Slightly larger config forcing the k-tiled fallback (multi-step reduction).
    d_model, d_inner, seq_len, bsz = 128, 512, 16, 4
    kx, kp, key = jax.random.split(key, 3)
    inp = jax.random.normal(kx, (seq_len, bsz, d_model), jnp.float32)
    params = make_params(kp, d_model, d_inner)
    out = jax.block_until_ready(
        positionwise_ff_primer_ez(inp, params, pre_lnorm=False,
                                  tk=256, force_ktiled=True))
    ref = _reference(inp, params, pre_lnorm=False)
    err = float(jnp.max(jnp.abs(out - ref)))
    assert err < 5e-3, ("ktiled", err)

    print("KERNEL_OK")
</pallas_src>

<mosaic_0001>
module attributes {stable_mosaic.version = 11 : i64} {
  func.func @_ffn_kernel_resident(%arg0: i32, %arg1: memref<8x32xf32, #tpu.memory_space<vmem>>, %arg2: memref<32x64xbf16, #tpu.memory_space<vmem>>, %arg3: memref<1x64xf32, #tpu.memory_space<vmem>>, %arg4: memref<64x32xbf16, #tpu.memory_space<vmem>>, %arg5: memref<1x32xf32, #tpu.memory_space<vmem>>, %arg6: memref<1x32xf32, #tpu.memory_space<vmem>>, %arg7: memref<1x32xf32, #tpu.memory_space<vmem>>, %arg8: memref<8x32xf32, #tpu.memory_space<vmem>>) attributes {dimension_semantics = [#tpu.dimension_semantics<parallel>], iteration_bounds = array<i64: 2>, scalar_prefetch = 0 : i64, scratch_operands = 0 : i64, tpu.core_type = #tpu.core_type<tc>, window_params = [{transform_indices = @transform_0, window_bounds = array<i64: 8, 32>}, {pipeline_mode = #tpu.pipeline_mode<synchronous>, transform_indices = @transform_1, window_bounds = array<i64: 32, 64>}, {pipeline_mode = #tpu.pipeline_mode<synchronous>, transform_indices = @transform_2, window_bounds = array<i64: 1, 64>}, {pipeline_mode = #tpu.pipeline_mode<synchronous>, transform_indices = @transform_3, window_bounds = array<i64: 64, 32>}, {pipeline_mode = #tpu.pipeline_mode<synchronous>, transform_indices = @transform_4, window_bounds = array<i64: 1, 32>}, {pipeline_mode = #tpu.pipeline_mode<synchronous>, transform_indices = @transform_5, window_bounds = array<i64: 1, 32>}, {pipeline_mode = #tpu.pipeline_mode<synchronous>, transform_indices = @transform_6, window_bounds = array<i64: 1, 32>}, {transform_indices = @transform_7, window_bounds = array<i64: 8, 32>}]} {
    %c0 = arith.constant 0 : index
    %c0_0 = arith.constant 0 : index
    %0 = vector.load %arg1[%c0, %c0_0] : memref<8x32xf32, #tpu.memory_space<vmem>>, vector<8x32xf32>
    %1 = arith.truncf %0 : vector<8x32xf32> to vector<8x32xbf16>
    %c0_1 = arith.constant 0 : index
    %c0_2 = arith.constant 0 : index
    %2 = vector.load %arg2[%c0_1, %c0_2] : memref<32x64xbf16, #tpu.memory_space<vmem>>, vector<32x64xbf16>
    %cst = arith.constant dense<0.000000e+00> : vector<8x64xf32>
    %3 = tpu.matmul %1, %2, %cst {dimension_numbers = #tpu.dot_dimension_numbers<[1], [0], [0], [1], [0, 0, 1, 1], [], []>} : vector<8x32xbf16>, vector<32x64xbf16>, vector<8x64xf32> -> vector<8x64xf32>
    %c0_3 = arith.constant 0 : index
    %c0_4 = arith.constant 0 : index
    %4 = vector.load %arg3[%c0_3, %c0_4] : memref<1x64xf32, #tpu.memory_space<vmem>>, vector<1x64xf32>
    %5 = vector.broadcast %4 : vector<1x64xf32> to vector<8x64xf32>
    %6 = arith.addf %3, %5 : vector<8x64xf32>
    %cst_5 = arith.constant 0.000000e+00 : f32
    %7 = vector.broadcast %cst_5 : f32 to vector<8x64xf32>
    %8 = arith.maximumf %6, %7 : vector<8x64xf32>
    %9 = arith.mulf %8, %8 : vector<8x64xf32>
    %10 = arith.truncf %9 : vector<8x64xf32> to vector<8x64xbf16>
    %c0_6 = arith.constant 0 : index
    %c0_7 = arith.constant 0 : index
    %11 = vector.load %arg4[%c0_6, %c0_7] : memref<64x32xbf16, #tpu.memory_space<vmem>>, vector<64x32xbf16>
    %cst_8 = arith.constant dense<0.000000e+00> : vector<8x32xf32>
    %12 = tpu.matmul %10, %11, %cst_8 {dimension_numbers = #tpu.dot_dimension_numbers<[1], [0], [0], [1], [0, 0, 1, 1], [], []>} : vector<8x64xbf16>, vector<64x32xbf16>, vector<8x32xf32> -> vector<8x32xf32>
    %c0_9 = arith.constant 0 : index
    %c0_10 = arith.constant 0 : index
    %13 = vector.load %arg5[%c0_9, %c0_10] : memref<1x32xf32, #tpu.memory_space<vmem>>, vector<1x32xf32>
    %14 = vector.broadcast %13 : vector<1x32xf32> to vector<8x32xf32>
    %15 = arith.addf %12, %14 : vector<8x32xf32>
    %16 = arith.addf %15, %0 : vector<8x32xf32>
    %c0_11 = arith.constant 0 : index
    %c0_12 = arith.constant 0 : index
    %17 = vector.load %arg6[%c0_11, %c0_12] : memref<1x32xf32, #tpu.memory_space<vmem>>, vector<1x32xf32>
    %c0_13 = arith.constant 0 : index
    %c0_14 = arith.constant 0 : index
    %18 = vector.load %arg7[%c0_13, %c0_14] : memref<1x32xf32, #tpu.memory_space<vmem>>, vector<1x32xf32>
    %cst_15 = arith.constant dense<0.000000e+00> : vector<8xf32>
    %19 = vector.multi_reduction <add>, %16, %cst_15 [1] : vector<8x32xf32> to vector<8xf32>
    %20 = vector.shape_cast %19 : vector<8xf32> to vector<8x1xf32>
    %cst_16 = arith.constant 3.200000e+01 : f32
    %21 = vector.broadcast %cst_16 : f32 to vector<8x1xf32>
    %22 = arith.divf %20, %21 : vector<8x1xf32>
    %23 = vector.broadcast %22 : vector<8x1xf32> to vector<8x32xf32>
    %24 = arith.subf %16, %23 : vector<8x32xf32>
    %25 = arith.mulf %24, %24 : vector<8x32xf32>
    %cst_17 = arith.constant dense<0.000000e+00> : vector<8xf32>
    %26 = vector.multi_reduction <add>, %25, %cst_17 [1] : vector<8x32xf32> to vector<8xf32>
    %27 = vector.shape_cast %26 : vector<8xf32> to vector<8x1xf32>
    %cst_18 = arith.constant 3.200000e+01 : f32
    %28 = vector.broadcast %cst_18 : f32 to vector<8x1xf32>
    %29 = arith.divf %27, %28 : vector<8x1xf32>
    %cst_19 = arith.constant 9.99999974E-6 : f32
    %30 = vector.broadcast %cst_19 : f32 to vector<8x1xf32>
    %31 = arith.addf %29, %30 : vector<8x1xf32>
    %32 = math.rsqrt %31 : vector<8x1xf32>
    %33 = vector.broadcast %32 : vector<8x1xf32> to vector<8x32xf32>
    %34 = arith.mulf %24, %33 : vector<8x32xf32>
    %35 = vector.broadcast %17 : vector<1x32xf32> to vector<8x32xf32>
    %36 = arith.mulf %34, %35 : vector<8x32xf32>
    %37 = vector.broadcast %18 : vector<1x32xf32> to vector<8x32xf32>
    %38 = arith.addf %36, %37 : vector<8x32xf32>
    %c0_20 = arith.constant 0 : index
    %c0_21 = arith.constant 0 : index
    %39 = vector.load %arg8[%c0_20, %c0_21] : memref<8x32xf32, #tpu.memory_space<vmem>>, vector<8x32xf32>
    tpu.vector_store %arg8[%c0_20, %c0_21], %38 {strides = array<i32>} : memref<8x32xf32, #tpu.memory_space<vmem>>, vector<8x32xf32>,
    return
  }
  func.func @transform_0(%arg0: i32) -> (i32, i32) {
    %c0_i32 = arith.constant 0 : i32
    %c0_i32_0 = arith.constant 0 : i32
    return %arg0, %c0_i32 : i32, i32
  }
  func.func @transform_1(%arg0: i32) -> (i32, i32) {
    %c0_i32 = arith.constant 0 : i32
    %c0_i32_0 = arith.constant 0 : i32
    %c0_i32_1 = arith.constant 0 : i32
    return %c0_i32, %c0_i32_0 : i32, i32
  }
  func.func @transform_2(%arg0: i32) -> (i32, i32) {
    %c0_i32 = arith.constant 0 : i32
    %c0_i32_0 = arith.constant 0 : i32
    %c0_i32_1 = arith.constant 0 : i32
    return %c0_i32, %c0_i32_0 : i32, i32
  }
  func.func @transform_3(%arg0: i32) -> (i32, i32) {
    %c0_i32 = arith.constant 0 : i32
    %c0_i32_0 = arith.constant 0 : i32
    %c0_i32_1 = arith.constant 0 : i32
    return %c0_i32, %c0_i32_0 : i32, i32
  }
  func.func @transform_4(%arg0: i32) -> (i32, i32) {
    %c0_i32 = arith.constant 0 : i32
    %c0_i32_0 = arith.constant 0 : i32
    %c0_i32_1 = arith.constant 0 : i32
    return %c0_i32, %c0_i32_0 : i32, i32
  }
  func.func @transform_5(%arg0: i32) -> (i32, i32) {
    %c0_i32 = arith.constant 0 : i32
    %c0_i32_0 = arith.constant 0 : i32
    %c0_i32_1 = arith.constant 0 : i32
    return %c0_i32, %c0_i32_0 : i32, i32
  }
  func.func @transform_6(%arg0: i32) -> (i32, i32) {
    %c0_i32 = arith.constant 0 : i32
    %c0_i32_0 = arith.constant 0 : i32
    %c0_i32_1 = arith.constant 0 : i32
    return %c0_i32, %c0_i32_0 : i32, i32
  }
  func.func @transform_7(%arg0: i32) -> (i32, i32) {
    %c0_i32 = arith.constant 0 : i32
    %c0_i32_0 = arith.constant 0 : i32
    return %arg0, %c0_i32 : i32, i32
  }
}

</mosaic_0001>

<bundles_post_ra>
// kernel: tpu_custom_call.1
= control target key start
LH: loop header
LB: loop body
LE: loop exit
PB: predicated region body
PF: predicated region fallthrough
CT: control target
= control target key end

     0   :  { %12 = vsyncpa [#allocation3], 0  ;;  %s860_s0 = inlined_call_operand.vmem [shape: f32[16,32], index: 0, kind: input, shape index: {}]   ;;  %s861_s1 = inlined_call_operand.vmem [shape: bf16[32,64], index: 1, kind: input, shape index: {}]   ;;  %s862_s2 = inlined_call_operand.vmem [shape: f32[1,64], index: 2, kind: input, shape index: {}]   ;;  %s863_s3 = inlined_call_operand.vmem [shape: bf16[64,32], index: 3, kind: input, shape index: {}]   ;;  %s864_s4 = inlined_call_operand.vmem [shape: f32[1,32], index: 4, kind: input, shape index: {}]   ;;  %s865_s5 = inlined_call_operand.vmem [shape: f32[1,32], index: 5, kind: input, shape index: {}]   ;;  %s866_s6 = inlined_call_operand.vmem [shape: f32[1,32], index: 6, kind: input, shape index: {}]   ;;  %s867_s7 = inlined_call_operand.hbm [shape: f32[16,32], index: 7, kind: output, shape index: {}]  }
   0x1   :  { %14 = vsyncpa [#allocation3 + $0x1], 0  ;;  %s739_s24 = smov 0   ;;  %s741_s25 = smov 0  }
   0x2   :  { %s743_s26 = smov 0   ;;  %s745_s27 = smov 0  }
   0x3 LB: > { %s760_s28 = sadd.s32 4294967295, %s694_s27   ;;  %s535_s29 = sadd.s32 4294967294, %s694_s27   ;;  %s694_s27 = sphi %s745_s27, %s873_s27   ;;  %s690_s26 = sphi %s743_s26, %s872_s26   ;;  %s686_s25 = sphi %s741_s25, %s871_s25   ;;  %s682_s24 = sphi %s739_s24, %s870_s24  }
   0x4   : > { %s764_s30 = sadd.s32 1, %s694_s27   ;;  %s179_s8 = sadd.s32 1, %s690_s26 }
   0x5   : > { %s176_s9 = ssub.s32 %s694_s27, %s764_s30  ;;  %p189_p0 = scmp.ne.s32.totalorder %s690_s26, %s686_s25 }
   0x6   : > { %p177_p1 = scmp.eq.s32.totalorder %s176_s9, 0  ;;  %p190_p2 = scmp.eq.s32.totalorder %s760_s28, 1 }
   0x7   : > { %p195_p3 = scmp.ne.s32.totalorder %s686_s25, %s682_s24  ;;  %p196_p4 = scmp.eq.s32.totalorder %s535_s29, 1 }
   0x8   : > { %s775_s10 = scalar_select %p177_p1, %s690_s26, %s179_s8  }
   0x9   : > { %p777_p5 = por %p190_p2, %p189_p0  ;;  %p781_p6 = por %p196_p4, %p195_p3 }
   0xa   : > { %p538_p7 = scmp.ge.s32.totalorder %s694_s27, 1  ;;  %p239_p8 = scmp.lt.s32.totalorder %s694_s27, 3 }
   0xc   : > { %p240_p9 = pnand %p538_p7, %p239_p8 }
   0xd   : > { %p270_p10 = scmp.lt.s32.totalorder (!%p240_p9), %s760_s28, 1  ;;  %s267_s20 = sand.u32 (!%p240_p9), 1, %s686_s25  }
   0xe   : > { %243 = sbr.rel (%p240_p9) target bundleno = 747 (0x2eb), region = 48  ;;  %s539_s21 = sshll.u32 (!%p240_p9), %s267_s20, 3 }
   0xf   : > { %s554_s9 = sshll.u32 (!%p240_p9), %s760_s28, 7  ;;  %s269_s13 = scalar_lea.vmem (!%p240_p9), [#allocation2], %s539_s21 }
  0x10   : > { %s476_s14 = sshll.u32 (!%p240_p9), %s269_s13, 4  ;;  %s474_s17 = scalar_lea.hbm (!%p240_p9), %s867_s7, %s554_s9  ;;  %s477_s14 = int_to_ptr.vmem [resolvable:$true] %s476_s14 }
  0x11   : > { %s463_s18 = scalar_lea.sflag (!%p240_p9), [#allocation3], %s267_s20 }
  0x13   : > { %v626_v0 = vld [vmem:[%s861_s1 + $0x8] sm:$0xff]   ;;  %v696_v1 = vmov 0.0   ;;  %v627_v2 = vld [vmem:[%s861_s1] sm:$0xff]   ;;  %vm697_vm0 = vmmov 0   ;;  %v628_v3 = vld [vmem:[%s863_s3 + $0x18] sm:$0xff]   ;;  %s271_s19 = scalar_select %p270_p10, %s760_s28, 1 }
  0x14   : > { %565 = vmatprep.subr.bf16.mxu0 %v696_v1  ;;  %573 = vmatprep.subr.bf16.mxu1 %v696_v1  ;;  %v629_v4 = vld [vmem:[%s863_s3 + $0x10] sm:$0xff]   ;;  %vm300_vm1 = vcmask 261120   ;;  %v630_v7 = vld [vmem:[%s863_s3 + $0x8] sm:$0xff]   ;;  %v631_v8 = vld [vmem:[%s863_s3] sm:$0xff]   ;;  %vm386_vm2 = vcmask 523264  }
  0x15   : > { %566 = vmatpush3.bf16.msra.mxu0 %v626_v0  ;;  %569 = vmatprep.mubr.msk.bf16.mxu0 %vm697_vm0, %v696_v1  ;;  %s540_s22 = sshll.u32 %s271_s19, 3  ;;  %v541_v9 = vld [vmem:[%s862_s2] ss:$0 sm:$0xff]  ;;  %s634_s19 = scalar_lea.vmem %s477_s14, 128 }
  0x16   : > { %567 = vmatprep.subr.bf16.mxu0 %v696_v1  ;;  %581 = vmatprep.mubr.msk.bf16.mxu1 %vm697_vm0, %v696_v1  ;;  %s273_s8 = scalar_lea.vmem %s860_s0, %s540_s22  ;;  %v545_v18 = vld [vmem:[%s864_s4] ss:$0 sm:$0xff]  ;;  %p635_p11 = scmp.ne.s32.totalorder %s477_s14, %s634_s19 }
  0x17   : > { %574 = vmatpush3.bf16.msra.mxu1 %v628_v3  ;;  %v275_v5 = vld [vmem:[%s273_s8] sm:$0xff]  ;;  %s698_s22 = smov [#allocation2]  }
  0x18   : > { %575 = vmatprep.subr.bf16.mxu1 %v696_v1  ;;  %v276_v6 = vpack.c.bf16 %v275_v5, %v275_v5  ;;  %v551_v35 = vld [vmem:[%s865_s5] ss:$0 sm:$0xff]  ;;  %p636_p12 = pnand %p635_p11, %p777_p5  ;;  %s638_s23 = sshll.u32 %s698_s22, 4  ;;  %s639_s23 = int_to_ptr.vmem [resolvable:$false] %s638_s23 }
  0x19   : > { %568 = vmatpush3.bf16.msra.mxu0 %v627_v2  ;;  %v552_v37 = vld [vmem:[%s866_s6] ss:$0 sm:$0xff]  ;;  %s640_s28 = scalar_lea.vmem %s639_s23, 256  ;;  %p641_p0 = scmp.lt.s32.totalorder %s477_s14, %s639_s23 }
  0x1a   : > { %p637_p13 = pneg %p636_p12  ;;  %p642_p1 = scmp.lt.s32.totalorder %s640_s28, %s634_s19 }
  0x1b   : > { %576 = vmatpush3.bf16.msra.mxu1 %v629_v4 }
  0x1c   : > { %577 = vmatprep.subr.bf16.mxu1 %v696_v1  ;;  %570 = vmatmul.mubr.msk.bf16.vlgmr.msra.gmra.mxu0 %vm300_vm1, %v276_v6  ;;  %p643_p2 = por %p642_p1, %p641_p0 }
  0x1e   : > { %p644_p3 = pnand %p643_p2, %p637_p13 }
  0x1f   : > { %578 = vmatpush3.bf16.msra.mxu1 %v630_v7 }
  0x20   : > { %579 = vmatprep.subr.bf16.mxu1 %v696_v1 }
  0x23   : > { %580 = vmatpush3.bf16.msra.mxu1 %v631_v8 }
  0xdc   : > { %v338_v10 = vpop.f32.mrf.mxu0 }
  0xdd   : > { %v339_v11 = vadd.f32 %v541_v9, %v338_v10 }
  0xde   : > { %v571_v12 = vpop.f32.mrf.mxu0 }
  0xdf   : > { %v344_v13 = vmax.f32 %v339_v11, 0.0 }
  0xe0   : > { %v341_v14 = vpop.f32.mrf.mxu0 }
  0xe1   : > { %v345_v15 = vmul.f32 %v344_v13, %v344_v13 }
  0xe2   : > { %v572_v16 = vpop.f32.mrf.mxu0 }
  0xe3   : > { %v346_v17 = vpack.c.bf16 %v345_v15, %v345_v15 }
  0xe5   : > { %582 = vmatmul.mubr.msk.bf16.vlgmr.msra.gmra.mxu1 %vm386_vm2, %v346_v17 }
 0x1a5   : > { %v424_v19 = vpop.f32.mrf.mxu1 }
 0x1a6   : > { %v425_v20 = vadd.f32 %v545_v18, %v424_v19 }
 0x1a7   : > { %v583_v21 = vpop.f32.mrf.mxu1 }
 0x1a8   : > { %v430_v22 = vadd.f32 %v425_v20, %v275_v5 }
 0x1a9   : > { %v427_v23 = vpop.f32.mrf.mxu1 }
 0x1aa   : > { %v433_v24 = vsel %vm300_vm1, %v430_v22, 0.0 }
 0x1ab   : > { %434 = vadd.xlane.f32.xlu0 %v433_v24  ;;  %v584_v25 = vpop.f32.mrf.mxu1 }
 0x234   : > { %v435_v26 = vpop.xlane.xlu0 %434 }
 0x235   : > { %v437_v27 = vmul.f32 0.03125, %v435_v26 }
 0x237   : > { %v438_v28 = vsub.f32 %v430_v22, %v437_v27 }
 0x239   : > { %v439_v29 = vmul.f32 %v438_v28, %v438_v28 }
 0x23b   : > { %v440_v30 = vsel %vm300_vm1, %v439_v29, 0.0 }
 0x23c   : > { %441 = vadd.xlane.f32.xlu0 %v440_v30 }
 0x2c5   : > { %v442_v31 = vpop.xlane.xlu0 %441 }
 0x2c6   : > { %v443_v32 = vmul.f32 0.03125, %v442_v31 }
 0x2c8   : > { %v444_v33 = vadd.f32 1e-05, %v443_v32 }
 0x2ca   : > { %632 = vrsqrt.f32 %v444_v33 }
 0x2d7   : > { %v633_v34 = vpop.eup %632 }
 0x2d8   : > { %v446_v36 = vmul.f32 %v633_v34, %v438_v28 }
 0x2da   : > { %v453_v38 = vmul.f32 %v551_v35, %v446_v36 }
 0x2dc   : > { %v460_v39 = vadd.f32 %v552_v37, %v453_v38 }
 0x2de   : > { %461 = vst.msk [vmem:[%s269_s13] sm:$0xff] %vm300_vm1, %v460_v39 }
 0x2df   : > { %647 = shalt.err (!%p644_p3)
}
 0x2e0   : > { %s648_s21 = scalar_lea.hbm %s474_s17, 128  ;;  %s652_s8 = scalar_lea.hbm %s867_s7, 256 }
 0x2e1   : > { %p649_p4 = scmp.ne.s32.totalorder %s474_s17, %s648_s21  ;;  %p653_p9 = scmp.lt.s32.totalorder %s474_s17, %s867_s7 }
 0x2e2   : > { %p654_p10 = scmp.lt.s32.totalorder %s652_s8, %s648_s21 }
 0x2e3   : > { %p650_p7 = pnand %p649_p4, %p777_p5 }
 0x2e4   : > { %p655_p11 = por %p654_p10, %p653_p9 }
 0x2e5   : > { %p651_p8 = pneg %p650_p7 }
 0x2e7   : > { %p656_p12 = pnand %p655_p11, %p651_p8 }
 0x2e9   : > { %659 = shalt.err (!%p656_p12)
}
 0x2ea   : > { %585 = dma.vmem_to_hbm [thread:$0]  (%p777_p5), %s477_s14, 128, %s474_s17, %s463_s18  }
 0x2eb PF: > { %p591_p13 = scmp.ge.s32.totalorder %s694_s27, 2  ;;  %s488_s15 = sand.u32 1, %s682_s24  }
 0x2ec   : > { %s489_s16 = scalar_lea.sflag [#allocation3], %s488_s15 }
 0x2ed   : > { %p588_p0 = pnand %p591_p13, %p781_p6 }
 0x2ef   : > { %p589_p1 = pneg %p588_p0 }
 0x2f1   : > { %677 = dma.done.wait (%p589_p1), %s489_s16, 128  }
 0x2f2   : > { %679 = vsyncadd (%p589_p1), %s489_s16, 4294967168  ;;  %p17_p2 = scmp.ge.s32.totalorder %s764_s30, 4   ;;  %s870_s24 = smov %s686_s25 }
 0x2f3   : > { %s871_s25 = smov %s690_s26  ;;  %s872_s26 = smov %s775_s10 }
 0x2f4   : > { %s873_s27 = smov %s764_s30  ;;  %19 = sbr.rel (!%p17_p2) target bundleno = 3 (0x3), region = 83 }
 0x2f9   :  { %494 = vsyncpa [#allocation3], 1 }
 0x2fa   :  { %496 = vsyncpa [#allocation3 + $0x1], 1 }

</bundles_post_ra>
